<compile_context>
chip_gen: v7x
topology: tpu7x:2x2x1
jax: 0.10.0
libtpu: 0.0.40
codegen_flags: <defaults>
</compile_context>

<pallas_src>
import functools

import jax
import jax.numpy as jnp
from jax import lax
from jax.experimental import pallas as pl
from jax.experimental.pallas import tpu as pltpu


def _mean_max_kernel(x_ref, o_ref, sum_acc, max_acc, arg_acc, *, seq_len, ragged_s):
    """One (TB, TS, H) input block; accumulate into (TB, H) scratch; finalize on last S step.

    x_ref:   (TB, TS, H) input block
    o_ref:   (TB, 2H) output block, resident across the S grid axis
    sum_acc: (TB, H) float32 running sum
    max_acc: (TB, H) running max in the input's native dtype (exact compares)
    arg_acc: (TB, H) int32 running argmax (first occurrence on ties)
    """
    s = pl.program_id(1)

    @pl.when(s == 0)
    def _init():
        sum_acc[...] = jnp.zeros_like(sum_acc)
        max_acc[...] = jnp.full_like(max_acc, -jnp.inf)
        arg_acc[...] = jnp.zeros_like(arg_acc)

    x = x_ref[...]
    tb, ts, h = x.shape
    # Local sequence position within this block (needed for the argmax either way).
    pos = lax.broadcasted_iota(jnp.int32, (tb, ts, h), 1)

    if ragged_s:
        # The last S block over-covers the array; mask the padded sequence rows so they
        # contribute 0 to the sum and -inf to the max.  (Static flag: no cost otherwise.)
        valid = (pos + s * ts) < seq_len
        x_sum = jnp.where(valid, x, 0)
        x_max = jnp.where(valid, x, -jnp.inf)
    else:
        x_sum = x
        x_max = x

    # Mean numerator: accumulate in f32 (values stay in native dtype everywhere else).
    sum_acc[...] += jnp.sum(x_sum, axis=1, dtype=jnp.float32)

    # Block max / argmax in the native dtype; first occurrence wins within the block.
    bmax = jnp.max(x_max, axis=1, keepdims=True)                 # (TB, 1, H)
    cand = jnp.where(x_max == bmax, pos, ts)                     # sentinel ts where not max
    barg = jnp.min(cand, axis=1) + s * ts                        # (TB, H) global index

    # Merge with the running max/argmax.  Strict '>' keeps the earlier block on ties,
    # matching torch.max / jnp.argmax first-occurrence semantics.
    bmax2 = bmax[:, 0, :]
    better = bmax2 > max_acc[...]
    max_acc[...] = jnp.where(better, bmax2, max_acc[...])
    arg_acc[...] = jnp.where(better, barg, arg_acc[...])

    @pl.when(s == pl.num_programs(1) - 1)
    def _finalize():
        hh = sum_acc.shape[-1]
        mean = sum_acc[...] * jnp.float32(1.0 / seq_len)
        o_ref[:, :hh] = mean.astype(o_ref.dtype)
        # torch.cat promotes the int64 indices to the float dtype.
        o_ref[:, hh:] = arg_acc[...].astype(o_ref.dtype)
    # TODO(synk): optional v7x micro-opt — compute the sequence sum on the idle MXU
    # (ones-vector dot_general) for bf16 inputs where the VALU slot is the binding unit.


def _round_up(x, m):
    return ((x + m - 1) // m) * m


def _vmem_limit_bytes():
    """Scoped-VMEM request: ~half of physical VMEM, clamped to [32, 96] MiB."""
    try:
        cap = pltpu.get_tpu_info().vmem_capacity_bytes
    except Exception:
        cap = 64 * 1024 * 1024  # conservative fallback -> 32 MiB scoped (safe on all gens)
    return int(max(32 * 1024 * 1024, min(cap // 2, 96 * 1024 * 1024)))


def _plan_tiles(B, S, H, itemsize, vmem_limit):
    """Pick (tile_b, tile_s) so double-buffered input + in-kernel temporaries fit VMEM."""
    g = 16 if itemsize == 2 else 8          # sublane packing of the (TB, 2H) output block
    bytes_per_elem = 2 * itemsize + 12      # 2x double-buffered input + iota/cand/f32 temps
    budget_elems = max(8 * 128, int(vmem_limit * 0.7) // bytes_per_elem)

    row_elems = S * H
    if row_elems <= budget_elems and budget_elems // row_elems >= min(B, g):
        # Whole (S, H) rows per grid step; tile only the batch axis.
        ts = S
        tb = min(B, budget_elems // row_elems)
        if tb < B:
            tb = max(g, (tb // g) * g)
    else:
        # Long/wide rows: also tile the sequence axis (running accumulators in the kernel).
        tb = B if B <= g else g
        ts = max(8, ((budget_elems // max(1, tb * H)) // 8) * 8)
        ts = min(ts, S)
        if S % ts != 0:
            # Prefer an S tile that divides S (skips the in-kernel ragged mask).
            ts_alt = _round_up(pl.cdiv(S, pl.cdiv(S, ts)), 8)
            if 0 < ts_alt <= S and S % ts_alt == 0:
                ts = ts_alt
        # TODO(synk): if H is so large that even (g, 8, H) blocks exceed the budget, tile H too.
    if ts >= S:
        ts = S

    # Megacore: prefer >= 2 (ideally an even number of) batch steps so both v7x TensorCores
    # get balanced work.  No effect on v5e/v6e (single TensorCore).
    nb = pl.cdiv(B, tb)
    if nb == 1 and B > 1:
        cand = _round_up(pl.cdiv(B, 2), g)
        if cand < B:
            tb = cand
    elif nb > 1 and nb % 2 == 1:
        cand = max(g, _round_up(pl.cdiv(B, nb + 1), g))
        if cand <= tb and pl.cdiv(B, cand) % 2 == 0:
            tb = cand
    return tb, ts


def mean_max_pooling(last_hidden_state, attention_mask=None, *, tile_b=None, tile_s=None):
    """Pallas TPU equivalent of MeanMaxPooling.forward.

    last_hidden_state: (B, S, H) float array -> (B, 2H) in the same float dtype:
      out[:, :H] = mean over the sequence axis; out[:, H:] = argmax index over it,
      cast to the float dtype (torch.cat promotion).
    attention_mask is accepted and ignored, exactly like the PyTorch forward().
    tile_b / tile_s override the tiling heuristic (used for testing).
    """
    del attention_mask  # unused in the PyTorch forward
    x = last_hidden_state
    if not jnp.issubdtype(x.dtype, jnp.floating):
        x = x.astype(jnp.float32)
    B, S, H = x.shape
    out_dtype = x.dtype
    itemsize = jnp.dtype(x.dtype).itemsize

    vmem_limit = _vmem_limit_bytes()
    tb, ts = _plan_tiles(B, S, H, itemsize, vmem_limit)
    if tile_b is not None:
        tb = int(tile_b)
    if tile_s is not None:
        ts = int(tile_s)
    tb = max(1, min(tb, B))
    ts = max(1, min(ts, S))

    n_b = pl.cdiv(B, tb)        # partial last batch block: OOB reads are per-row garbage,
    n_s = pl.cdiv(S, ts)        # OOB output rows are masked on write-back -> no jnp.pad.
    ragged_s = (S % ts) != 0    # only then do padded sequence rows need in-kernel masking

    kernel = functools.partial(_mean_max_kernel, seq_len=S, ragged_s=ragged_s)

    cost = pl.CostEstimate(
        flops=5 * B * S * H,
        transcendentals=0,
        bytes_accessed=B * S * H * itemsize + B * 2 * H * jnp.dtype(out_dtype).itemsize,
    )

    return pl.pallas_call(
        kernel,
        out_shape=jax.ShapeDtypeStruct((B, 2 * H), out_dtype),
        grid_spec=pltpu.PrefetchScalarGridSpec(
            num_scalar_prefetch=0,
            grid=(n_b, n_s),
            in_specs=[pl.BlockSpec((tb, ts, H), lambda b, s: (b, s, 0))],
            out_specs=pl.BlockSpec((tb, 2 * H), lambda b, s: (b, 0)),
            scratch_shapes=[
                pltpu.VMEM((tb, H), jnp.float32),   # running sum (f32 accumulate)
                pltpu.VMEM((tb, H), x.dtype),       # running max (native dtype, exact)
                pltpu.VMEM((tb, H), jnp.int32),     # running argmax
            ],
        ),
        compiler_params=pltpu.CompilerParams(
            dimension_semantics=("parallel", "arbitrary"),
            vmem_limit_bytes=vmem_limit,
        ),
        cost_estimate=cost,
    )(x)


def _reference(last_hidden_state):
    x = last_hidden_state
    ref_mean = jnp.mean(x.astype(jnp.float32), axis=1)
    ref_arg = jnp.argmax(x, axis=1)
    out_dtype = x.dtype
    return jnp.concatenate(
        [ref_mean.astype(out_dtype), ref_arg.astype(out_dtype)], axis=1
    )


if __name__ == "__main__":
    key = jax.random.PRNGKey(0)
    k1, k2, k3, k4 = jax.random.split(key, 4)

    # 1) Small shape matching the module's forward: (B, S, H) + unused attention mask.
    B, S, H = 2, 8, 32
    last_hidden_state = jax.random.normal(k1, (B, S, H), dtype=jnp.float32)
    attention_mask = jnp.ones((B, S), dtype=jnp.int32)  # unused, present for signature parity
    out = jax.block_until_ready(mean_max_pooling(last_hidden_state, attention_mask))
    ref = _reference(last_hidden_state)
    assert out.shape == (B, 2 * H)
    assert jnp.allclose(out, ref, atol=1e-6, rtol=1e-6)

    # 2) Batch-tiled path with a partial final batch block (B=20 -> blocks of 16 + 4),
    #    no jnp.pad / extra HBM copy.
    x2 = jax.random.normal(k2, (20, 16, 128), dtype=jnp.float32)
    out2 = jax.block_until_ready(mean_max_pooling(x2, None))
    ref2 = _reference(x2)
    assert out2.shape == (20, 256)
    assert jnp.allclose(out2, ref2, atol=1e-6, rtol=1e-6)

    # 3) Forced sequence-split path: running sum/max/argmax accumulators over the S grid
    #    axis with a ragged (masked) final S block (S=24 processed as 16 + 8).
    x3 = jax.random.normal(k3, (4, 24, 128), dtype=jnp.float32)
    out3 = jax.block_until_ready(mean_max_pooling(x3, None, tile_b=4, tile_s=16))
    ref3 = _reference(x3)
    assert out3.shape == (4, 256)
    assert jnp.allclose(out3, ref3, atol=1e-5, rtol=1e-5)

    # 4) bf16 inputs: native-dtype max/compare, f32 mean accumulation, bf16 stores.
    x4 = jax.random.normal(k4, (16, 32, 128), dtype=jnp.bfloat16)
    out4 = jax.block_until_ready(mean_max_pooling(x4, None))
    ref4 = _reference(x4)
    assert out4.shape == (16, 256)
    assert jnp.allclose(out4.astype(jnp.float32), ref4.astype(jnp.float32),
                        atol=1e-2, rtol=1e-2)

    print("KERNEL_OK")
</pallas_src>

<mosaic_0001>
module attributes {stable_mosaic.version = 11 : i64} {
  func.func @_mean_max_kernel(%arg0: i32, %arg1: i32, %arg2: memref<2x8x32xf32, #tpu.memory_space<vmem>>, %arg3: memref<2x64xf32, #tpu.memory_space<vmem>>, %arg4: memref<2x32xf32, #tpu.memory_space<vmem>>, %arg5: memref<2x32xf32, #tpu.memory_space<vmem>>, %arg6: memref<2x32xi32, #tpu.memory_space<vmem>>) attributes {dimension_semantics = [#tpu.dimension_semantics<parallel>, #tpu.dimension_semantics<arbitrary>], iteration_bounds = array<i64: 1, 1>, scalar_prefetch = 0 : i64, scratch_operands = 3 : i64, tpu.core_type = #tpu.core_type<tc>, window_params = [{transform_indices = @transform_0, window_bounds = array<i64: 2, 8, 32>}, {transform_indices = @transform_1, window_bounds = array<i64: 2, 64>}]} {
    %c0_i32 = arith.constant 0 : i32
    %0 = arith.cmpi eq, %arg1, %c0_i32 : i32
    %1 = arith.extui %0 : i1 to i32
    %c0_i32_0 = arith.constant 0 : i32
    %2 = arith.cmpi ne, %1, %c0_i32_0 : i32
    scf.if %2 {
      %cst_22 = arith.constant 0.000000e+00 : f32
      %31 = vector.broadcast %cst_22 : f32 to vector<2x32xf32>
      %c0_23 = arith.constant 0 : index
      %c0_24 = arith.constant 0 : index
      %32 = vector.load %arg4[%c0_23, %c0_24] : memref<2x32xf32, #tpu.memory_space<vmem>>, vector<2x32xf32>
      tpu.vector_store %arg4[%c0_23, %c0_24], %31 {strides = array<i32>} : memref<2x32xf32, #tpu.memory_space<vmem>>, vector<2x32xf32>,
      %cst_25 = arith.constant 0xFF800000 : f32
      %33 = vector.broadcast %cst_25 : f32 to vector<2x32xf32>
      %c0_26 = arith.constant 0 : index
      %c0_27 = arith.constant 0 : index
      %34 = vector.load %arg5[%c0_26, %c0_27] : memref<2x32xf32, #tpu.memory_space<vmem>>, vector<2x32xf32>
      tpu.vector_store %arg5[%c0_26, %c0_27], %33 {strides = array<i32>} : memref<2x32xf32, #tpu.memory_space<vmem>>, vector<2x32xf32>,
      %c0_i32_28 = arith.constant 0 : i32
      %35 = vector.broadcast %c0_i32_28 : i32 to vector<2x32xi32>
      %c0_29 = arith.constant 0 : index
      %c0_30 = arith.constant 0 : index
      %36 = vector.load %arg6[%c0_29, %c0_30] : memref<2x32xi32, #tpu.memory_space<vmem>>, vector<2x32xi32>
      tpu.vector_store %arg6[%c0_29, %c0_30], %35 {strides = array<i32>} : memref<2x32xi32, #tpu.memory_space<vmem>>, vector<2x32xi32>,
    } else {
    }
    %c0 = arith.constant 0 : index
    %c0_1 = arith.constant 0 : index
    %c0_2 = arith.constant 0 : index
    %3 = vector.load %arg2[%c0, %c0_1, %c0_2] : memref<2x8x32xf32, #tpu.memory_space<vmem>>, vector<2x8x32xf32>
    %4 = tpu.iota {dimensions = array<i32: 1>} : vector<2x8x32xi32>
    %c0_3 = arith.constant 0 : index
    %c0_4 = arith.constant 0 : index
    %5 = vector.load %arg4[%c0_3, %c0_4] : memref<2x32xf32, #tpu.memory_space<vmem>>, vector<2x32xf32>
    %cst = arith.constant dense<0.000000e+00> : vector<2x32xf32>
    %6 = vector.multi_reduction <add>, %3, %cst [1] : vector<2x8x32xf32> to vector<2x32xf32>
    %7 = arith.addf %5, %6 : vector<2x32xf32>
    %c0_5 = arith.constant 0 : index
    %c0_6 = arith.constant 0 : index
    %8 = vector.load %arg4[%c0_5, %c0_6] : memref<2x32xf32, #tpu.memory_space<vmem>>, vector<2x32xf32>
    tpu.vector_store %arg4[%c0_5, %c0_6], %7 {strides = array<i32>} : memref<2x32xf32, #tpu.memory_space<vmem>>, vector<2x32xf32>,
    %cst_7 = arith.constant dense<0xFF800000> : vector<2x32xf32>
    %9 = vector.multi_reduction <maximumf>, %3, %cst_7 [1] : vector<2x8x32xf32> to vector<2x32xf32>
    %10 = vector.shape_cast %9 : vector<2x32xf32> to vector<2x1x32xf32>
    %11 = vector.broadcast %10 : vector<2x1x32xf32> to vector<2x8x32xf32>
    %12 = arith.cmpf oeq, %3, %11 : vector<2x8x32xf32>
    %c8_i32 = arith.constant 8 : i32
    %13 = vector.broadcast %c8_i32 : i32 to vector<2x8x32xi32>
    %14 = arith.select %12, %4, %13 : vector<2x8x32xi1>, vector<2x8x32xi32>
    %cst_8 = arith.constant dense<2147483647> : vector<2x32xi32>
    %15 = vector.multi_reduction <minsi>, %14, %cst_8 [1] : vector<2x8x32xi32> to vector<2x32xi32>
    %c8_i32_9 = arith.constant 8 : i32
    %16 = arith.muli %arg1, %c8_i32_9 : i32
    %17 = vector.broadcast %16 : i32 to vector<2x32xi32>
    %18 = arith.addi %15, %17 : vector<2x32xi32>
    %19 = vector.shape_cast %10 : vector<2x1x32xf32> to vector<2x32xf32>
    %c0_10 = arith.constant 0 : index
    %c0_11 = arith.constant 0 : index
    %20 = vector.load %arg5[%c0_10, %c0_11] : memref<2x32xf32, #tpu.memory_space<vmem>>, vector<2x32xf32>
    %21 = arith.cmpf ogt, %19, %20 : vector<2x32xf32>
    %c0_12 = arith.constant 0 : index
    %c0_13 = arith.constant 0 : index
    %22 = vector.load %arg5[%c0_12, %c0_13] : memref<2x32xf32, #tpu.memory_space<vmem>>, vector<2x32xf32>
    %23 = arith.select %21, %19, %22 : vector<2x32xi1>, vector<2x32xf32>
    %c0_14 = arith.constant 0 : index
    %c0_15 = arith.constant 0 : index
    %24 = vector.load %arg5[%c0_14, %c0_15] : memref<2x32xf32, #tpu.memory_space<vmem>>, vector<2x32xf32>
    tpu.vector_store %arg5[%c0_14, %c0_15], %23 {strides = array<i32>} : memref<2x32xf32, #tpu.memory_space<vmem>>, vector<2x32xf32>,
    %c0_16 = arith.constant 0 : index
    %c0_17 = arith.constant 0 : index
    %25 = vector.load %arg6[%c0_16, %c0_17] : memref<2x32xi32, #tpu.memory_space<vmem>>, vector<2x32xi32>
    %26 = arith.select %21, %18, %25 : vector<2x32xi1>, vector<2x32xi32>
    %c0_18 = arith.constant 0 : index
    %c0_19 = arith.constant 0 : index
    %27 = vector.load %arg6[%c0_18, %c0_19] : memref<2x32xi32, #tpu.memory_space<vmem>>, vector<2x32xi32>
    tpu.vector_store %arg6[%c0_18, %c0_19], %26 {strides = array<i32>} : memref<2x32xi32, #tpu.memory_space<vmem>>, vector<2x32xi32>,
    %c0_i32_20 = arith.constant 0 : i32
    %28 = arith.cmpi eq, %arg1, %c0_i32_20 : i32
    %29 = arith.extui %28 : i1 to i32
    %c0_i32_21 = arith.constant 0 : i32
    %30 = arith.cmpi ne, %29, %c0_i32_21 : i32
    scf.if %30 {
      %c0_22 = arith.constant 0 : index
      %c0_23 = arith.constant 0 : index
      %31 = vector.load %arg4[%c0_22, %c0_23] : memref<2x32xf32, #tpu.memory_space<vmem>>, vector<2x32xf32>
      %cst_24 = arith.constant 1.250000e-01 : f32
      %32 = vector.broadcast %cst_24 : f32 to vector<2x32xf32>
      %33 = arith.mulf %31, %32 : vector<2x32xf32>
      %c0_25 = arith.constant 0 : index
      %c0_26 = arith.constant 0 : index
      %34 = vector.load %arg3[%c0_25, %c0_26] : memref<2x64xf32, #tpu.memory_space<vmem>>, vector<2x32xf32>
      tpu.vector_store %arg3[%c0_25, %c0_26], %33 {strides = array<i32>} : memref<2x64xf32, #tpu.memory_space<vmem>>, vector<2x32xf32>,
      %c0_27 = arith.constant 0 : index
      %c0_28 = arith.constant 0 : index
      %35 = vector.load %arg6[%c0_27, %c0_28] : memref<2x32xi32, #tpu.memory_space<vmem>>, vector<2x32xi32>
      %36 = arith.sitofp %35 : vector<2x32xi32> to vector<2x32xf32>
      %c0_29 = arith.constant 0 : index
      %c32 = arith.constant 32 : index
      %37 = vector.load %arg3[%c0_29, %c32] : memref<2x64xf32, #tpu.memory_space<vmem>>, vector<2x32xf32>
      tpu.vector_store %arg3[%c0_29, %c32], %36 {strides = array<i32>} : memref<2x64xf32, #tpu.memory_space<vmem>>, vector<2x32xf32>,
    } else {
    }
    return
  }
  func.func @transform_0(%arg0: i32, %arg1: i32) -> (i32, i32, i32) {
    %c0_i32 = arith.constant 0 : i32
    %c0_i32_0 = arith.constant 0 : i32
    return %arg0, %arg1, %c0_i32 : i32, i32, i32
  }
  func.func @transform_1(%arg0: i32, %arg1: i32) -> (i32, i32) {
    %c0_i32 = arith.constant 0 : i32
    %c0_i32_0 = arith.constant 0 : i32
    return %arg0, %c0_i32 : i32, i32
  }
}

</mosaic_0001>

<bundles_post_ra>
// kernel: tpu_custom_call.1
= control target key start
LH: loop header
LB: loop body
LE: loop exit
PB: predicated region body
PF: predicated region fallthrough
CT: control target
= control target key end

     0   :  { %6 = vsyncpa [#allocation6], 0  ;;  %s276_s0 = inlined_call_operand.hbm [shape: f32[2,8,32], index: 0, kind: input, shape index: {}]   ;;  %s277_s1 = inlined_call_operand.hbm [shape: f32[2,64], index: 1, kind: output, shape index: {}]  }
   0x1   :  { %7 = vsyncpa [#allocation7], 0  ;;  %s208_s6 = smov [#allocation5]   ;;  %s160_s10 = scalar_lea.hbm %s276_s0, 256 }
   0x2   :  { %s13_s7 = sshll.u32 %s208_s6, 4  ;;  %p161_p0 = scmp.ne.s32.totalorder %s276_s0, %s160_s10  ;;  %s14_s7 = int_to_ptr.vmem [resolvable:$true] %s13_s7 }
   0x3   :  { %p164_p1 = scmp.lt.u32.totalorder %s160_s10, %s276_s0 }
   0x5   :  { %p166_p2 = pnand %p164_p1, %p161_p0 }
   0x7   :  { %169 = shalt.err (!%p166_p2)
}
   0x8   :  { %s170_s15 = scalar_lea.vmem %s14_s7, 256  ;;  %p175_p4 = scmp.lt.s32.totalorder %s14_s7, %s14_s7 }
   0x9   :  { %p171_p3 = scmp.ne.s32.totalorder %s14_s7, %s170_s15  ;;  %p176_p5 = scmp.lt.s32.totalorder %s170_s15, %s170_s15 }
   0xb   :  { %p177_p6 = por %p176_p5, %p175_p4 }
   0xd   :  { %p178_p7 = pnand %p177_p6, %p171_p3 }
   0xf   :  { %181 = shalt.err (!%p178_p7)
}
  0x10   :  { %s209_s16 = smov 128   ;;  %s210_s17 = smov 8  }
  0x11   :  { %19 = dma.hbm_to_vmem [thread:$0]  %s276_s0, 256, %s14_s7, [#allocation6], %s209_s16, %s209_s16, %s210_s17  }
  0x12   :  { %204 = dma.done.wait [#allocation6], 256  }
  0x13   :  { %205 = vsyncadd [#allocation6], 4294967040  ;;  %vm27_vm0 = vcmask 254976   ;;  %v211_v0 = vmov 0.0   ;;  %v212_v1 = vmov -inf   ;;  %v213_v2 = vmov 0  }
  0x14   :  { %28 = vst.msk [vmem:[#allocation2] sm:$0x3] %vm27_vm0, %v211_v0  ;;  %29 = vst.msk [vmem:[#allocation3] sm:$0x3] %vm27_vm0, %v212_v1  ;;  %vm36_vm1 = vcmask 261120   ;;  %v31_v3 = vld [vmem:[#allocation5] sm:$0xff]  ;;  %v33_v21 = vlaneseq }
  0x15   :  { %30 = vst.msk [vmem:[#allocation4] sm:$0x3] %vm27_vm0, %v213_v2  ;;  %v32_v4 = vld [vmem:[#allocation5 + $0x8] sm:$0xff]  ;;  %v37_v5 = vsel %vm36_vm1, %v31_v3, 0.0  ;;  %v59_v7 = vsel %vm36_vm1, %v31_v3, -inf  ;;  %vm53_vm2 = vcmask 1041409  }
  0x16   :  { %v44_v6 = vsel %vm36_vm1, %v32_v4, 0.0  ;;  %v66_v8 = vsel %vm36_vm1, %v32_v4, -inf  ;;  %v38_v9 = vrot.slane %v37_v5, 4  ;;  %v60_v11 = vrot.slane %v59_v7, 4  ;;  %s214_s0 = smov 32   ;;  %s215_s20 = smov [#allocation8]  }
  0x17   :  { %v45_v10 = vrot.slane %v44_v6, 4  ;;  %v67_v12 = vrot.slane %v66_v8, 4  ;;  %v34_v31 = vshrl.u32 %v33_v21, 7  ;;  %s143_s21 = sshll.u32 %s215_s20, 4  ;;  %vm135_vm13 = vcmask 517376   ;;  %s144_s21 = int_to_ptr.vmem [resolvable:$true] %s143_s21 }
  0x18   :  { %v39_v13 = vadd.f32 %v38_v9, %v37_v5  ;;  %v61_v15 = vmax.f32 %v59_v7, %v60_v11  ;;  %s182_s22 = scalar_lea.vmem %s144_s21, 32  ;;  %p187_p9 = scmp.lt.s32.totalorder %s144_s21, %s144_s21 }
  0x19   :  { %v46_v14 = vadd.f32 %v45_v10, %v44_v6  ;;  %v68_v16 = vmax.f32 %v66_v8, %v67_v12  ;;  %p183_p8 = scmp.ne.s32.totalorder %s144_s21, %s182_s22  ;;  %p188_p10 = scmp.lt.s32.totalorder %s182_s22, %s182_s22 }
  0x1a   :  { %v40_v17 = vrot.slane %v39_v13, 2  ;;  %v62_v19 = vrot.slane %v61_v15, 2 }
  0x1b   :  { %v47_v18 = vrot.slane %v46_v14, 2  ;;  %v69_v20 = vrot.slane %v68_v16, 2  ;;  %v101_v26 = vld [vmem:[#allocation3] sm:$0x3]  ;;  %v35_v33 = vld [vmem:[#allocation2] sm:$0x3]  ;;  %p189_p11 = por %p188_p10, %p187_p9 }
  0x1c   :  { %v41_v22 = vadd.f32 %v40_v17, %v39_v13  ;;  %v63_v24 = vmax.f32 %v61_v15, %v62_v19  ;;  %v103_v32 = vrot.slane %v101_v26, 1  ;;  %v116_v55 = vld [vmem:[#allocation4] sm:$0x3] }
  0x1d   :  { %v48_v23 = vadd.f32 %v47_v18, %v46_v14  ;;  %v70_v25 = vmax.f32 %v68_v16, %v69_v20  ;;  %v117_v60 = vrot.slane %v116_v55, 1  ;;  %p190_p12 = pnand %p189_p11, %p183_p8 }
  0x1e   :  { %v42_v27 = vrot.slane %v41_v22, 1  ;;  %v64_v29 = vrot.slane %v63_v24, 1 }
  0x1f   :  { %v49_v28 = vrot.slane %v48_v23, 1  ;;  %v71_v30 = vrot.slane %v70_v25, 1 }
  0x20   :  { %v43_v34 = vadd.f32 %v42_v27, %v41_v22  ;;  %v65_v36 = vmax.f32 %v63_v24, %v64_v29 }
  0x21   :  { %v50_v35 = vadd.f32 %v49_v28, %v48_v23  ;;  %v72_v37 = vmax.f32 %v70_v25, %v71_v30 }
  0x22   :  { %vm73_vm3 = vcmp.eq.f32.partialorder %v31_v3, %v65_v36  ;;  %vm106_vm5 = vcmp.gt.f32.partialorder %v65_v36, %v101_v26 }
  0x23   :  { %v54_v38 = vsel %vm53_vm2, %v50_v35, %v43_v34  ;;  %vm74_vm4 = vcmp.eq.f32.partialorder %v32_v4, %v72_v37  ;;  %v75_v40 = vsel %vm73_vm3, %v34_v31, 8  ;;  %vm246_vm6 = vcmp.gt.f32.partialorder %v72_v37, %v103_v32 }
  0x24   :  { %v56_v39 = vadd.f32 %v54_v38, %v35_v33  ;;  %v76_v41 = vsel %vm74_vm4, %v34_v31, 8  ;;  %v77_v43 = vsel %vm36_vm1, %v75_v40, 2147483647  ;;  %v108_v45 = vsel %vm106_vm5, %v65_v36, %v101_v26 }
  0x25   :  { %v87_v44 = vsel %vm36_vm1, %v76_v41, 2147483647  ;;  %v109_v46 = vsel %vm246_vm6, %v72_v37, %v103_v32  ;;  %v78_v47 = vrot.slane %v77_v43, 4 }
  0x26   :  { %v88_v48 = vrot.slane %v87_v44, 4  ;;  %v112_v49 = vrot.slane %v109_v46, 7  ;;  %58 = vst.msk [vmem:[#allocation2] sm:$0x3] %vm27_vm0, %v56_v39 }
  0x27   :  { %vm79_vm7 = vcmp.lt.s32.totalorder %v77_v43, %v78_v47 }
  0x28   :  { %vm89_vm8 = vcmp.lt.s32.totalorder %v87_v44, %v88_v48  ;;  %v113_v50 = vsel %vm53_vm2, %v112_v49, %v108_v45  ;;  %v80_v51 = vsel %vm79_vm7, %v77_v43, %v78_v47 }
  0x29   :  { %v90_v52 = vsel %vm89_vm8, %v87_v44, %v88_v48  ;;  %115 = vst.msk [vmem:[#allocation3] sm:$0x3] %vm27_vm0, %v113_v50  ;;  %v81_v53 = vrot.slane %v80_v51, 2 }
  0x2a   :  { %v91_v54 = vrot.slane %v90_v52, 2 }
  0x2b   :  { %vm82_vm9 = vcmp.lt.s32.totalorder %v80_v51, %v81_v53 }
  0x2c   :  { %vm92_vm10 = vcmp.lt.s32.totalorder %v90_v52, %v91_v54  ;;  %v83_v56 = vsel %vm82_vm9, %v80_v51, %v81_v53 }
  0x2d   :  { %v93_v57 = vsel %vm92_vm10, %v90_v52, %v91_v54  ;;  %v84_v58 = vrot.slane %v83_v56, 1  ;;  %v126_v61 = vld [vmem:[#allocation2] sm:$0x3] }
  0x2e   :  { %v94_v59 = vrot.slane %v93_v57, 1  ;;  %v127_v62 = vmul.f32 0.125, %v126_v61 }
  0x2f   :  { %vm85_vm11 = vcmp.lt.s32.totalorder %v83_v56, %v84_v58 }
  0x30   :  { %vm95_vm12 = vcmp.lt.s32.totalorder %v93_v57, %v94_v59  ;;  %v86_v63 = vsel %vm85_vm11, %v83_v56, %v84_v58  ;;  %128 = vst.msk [vmem:[#allocation8] sm:$0x3] %vm27_vm0, %v127_v62 }
  0x31   :  { %v96_v0 = vsel %vm95_vm12, %v93_v57, %v94_v59  ;;  %v118_v1 = vsel %vm106_vm5, %v86_v63, %v116_v55 }
  0x32   :  { %v119_v2 = vsel %vm246_vm6, %v96_v0, %v117_v60 }
  0x33   :  { %v120_v3 = vrot.slane %v119_v2, 7 }
  0x35   :  { %v121_v4 = vsel %vm53_vm2, %v120_v3, %v118_v1 }
  0x36   :  { %122 = vst.msk [vmem:[#allocation4] sm:$0x3] %vm27_vm0, %v121_v4 }
  0x3d   :  { %v129_v5 = vld [vmem:[#allocation4] sm:$0x3] }
  0x3e   :  { %v130_v6 = vcvt.s32.f32 %v129_v5 }
  0x40   :  { %132 = vrot.lane.b32.xlu0 %v130_v6, %s214_s0 }
  0xb2   :  { %v133_v7 = vpop.permute.xlu0 %132 }
  0xb3   :  { %136 = vst.msk [vmem:[#allocation8] sm:$0x3] %vm135_vm13, %v133_v7 }
  0xb4   :  { %193 = shalt.err (!%p190_p12)
}
  0xb5   :  { %s194_s25 = scalar_lea.hbm %s277_s1, 32 }
  0xb6   :  { %p195_p13 = scmp.ne.s32.totalorder %s277_s1, %s194_s25  ;;  %p198_p0 = scmp.lt.u32.totalorder %s194_s25, %s277_s1 }
  0xb8   :  { %p200_p1 = pnand %p198_p0, %p195_p13 }
  0xba   :  { %203 = shalt.err (!%p200_p1)
}
  0xbb   :  { %146 = dma.vmem_to_hbm [thread:$0]  %s144_s21, 32, %s277_s1, [#allocation7]  }
  0xbc   :  { %206 = dma.done.wait [#allocation7], 32  }
  0xbd   :  { %207 = vsyncadd [#allocation7], 4294967264 }
  0xbe   :  { %150 = vsyncpa [#allocation6], 1 }
  0xbf   :  { %151 = vsyncpa [#allocation7], 1 }

</bundles_post_ra>
